<compile_context>
chip_gen: v6e
topology: v6e:2x2x1
jax: 0.10.0
libtpu: 0.0.40
codegen_flags: <defaults>
</compile_context>

<pallas_src>
import functools

import jax
import jax.numpy as jnp
from jax.experimental import pallas as pl
from jax.experimental.pallas import tpu as pltpu


def _round_up(x, m):
    return ((x + m - 1) // m) * m


def _residual_mlp_kernel(depth,
                         x_ref, w_in_ref, b_in_ref,
                         w_blk_ref, b_blk_ref,
                         w_out_ref, b_out_ref,
                         o_ref):
    """ResidualMLP forward for one batch tile; weights resident in VMEM."""
    # Input projection: (TILE_B, Din_p) @ (Din_p, W_p) -> f32 acc, + f32 bias.
    h = jnp.dot(x_ref[...], w_in_ref[...],
                preferred_element_type=jnp.float32) + b_in_ref[...]

    # Residual blocks (depth is static -> unrolled at trace time).
    for d in range(depth):
        a = jnp.maximum(h, 0.0).astype(w_blk_ref.dtype)       # relu, bf16 for MXU
        h = h + jnp.dot(a, w_blk_ref[d],
                        preferred_element_type=jnp.float32) + b_blk_ref[d]

    # Final activation + output projection.
    a = jnp.maximum(h, 0.0).astype(w_out_ref.dtype)
    o_ref[...] = (jnp.dot(a, w_out_ref[...],
                          preferred_element_type=jnp.float32)
                  + b_out_ref[...]).astype(o_ref.dtype)


def residual_mlp(x, params, *, depth, tile_b=512, compute_dtype=jnp.bfloat16):
    """x: (B, input_dim) f32. params: dict of pre-transposed f32 weights/biases."""
    B, Din = x.shape
    W = params["w_in"].shape[1]
    Dout = params["w_out"].shape[1]

    # Lane-dense padded dims (multiples of 128) and batch tile (multiple of 8).
    Din_p = _round_up(Din, 128)
    W_p = _round_up(W, 128)
    Dout_p = _round_up(Dout, 128)
    tile_b = _round_up(max(8, min(tile_b, _round_up(B, 8))), 8)
    B_p = _round_up(B, tile_b)
    n_tiles = B_p // tile_b

    cd = jnp.dtype(compute_dtype)

    # Zero-pad and cast in the wrapper (exact: padded lanes/rows contribute 0).
    x_p = jnp.zeros((B_p, Din_p), cd).at[:B, :Din].set(x.astype(cd))
    w_in_p = jnp.zeros((Din_p, W_p), cd).at[:Din, :W].set(params["w_in"].astype(cd))
    b_in_p = jnp.zeros((1, W_p), jnp.float32).at[:, :W].set(params["b_in"])
    w_blk_p = jnp.zeros((depth, W_p, W_p), cd).at[:, :W, :W].set(
        params["w_blk"].astype(cd))
    b_blk_p = jnp.zeros((depth, 1, W_p), jnp.float32).at[:, :, :W].set(params["b_blk"])
    w_out_p = jnp.zeros((W_p, Dout_p), cd).at[:W, :Dout].set(params["w_out"].astype(cd))
    b_out_p = jnp.zeros((1, Dout_p), jnp.float32).at[:, :Dout].set(params["b_out"])

    kernel = functools.partial(_residual_mlp_kernel, depth)

    # VMEM budget (double-buffered worst case) -> scoped limit with headroom,
    # capped at 64 MiB so it stays within v7x physical VMEM.
    weight_bytes = (w_in_p.size + w_blk_p.size + w_out_p.size) * cd.itemsize
    bias_bytes = (b_in_p.size + b_blk_p.size + b_out_p.size) * 4
    tile_bytes = tile_b * Din_p * cd.itemsize + tile_b * Dout_p * 4
    vmem_need = 2 * (weight_bytes + bias_bytes + tile_bytes)
    vmem_limit = int(min(max(vmem_need + (8 << 20), 32 << 20), 64 << 20))

    flops = 2 * B_p * (Din_p * W_p + depth * W_p * W_p + W_p * Dout_p)
    bytes_accessed = (x_p.size * cd.itemsize + weight_bytes + bias_bytes
                      + B_p * Dout_p * 4)

    out_p = pl.pallas_call(
        kernel,
        out_shape=jax.ShapeDtypeStruct((B_p, Dout_p), jnp.float32),
        grid=(n_tiles,),
        in_specs=[
            pl.BlockSpec((tile_b, Din_p), lambda i: (i, 0)),          # x: tiled
            pl.BlockSpec((Din_p, W_p), lambda i: (0, 0)),             # weights:
            pl.BlockSpec((1, W_p), lambda i: (0, 0)),                 #   constant
            pl.BlockSpec((depth, W_p, W_p), lambda i: (0, 0, 0)),     #   index_map
            pl.BlockSpec((depth, 1, W_p), lambda i: (0, 0, 0)),       #   -> resident
            pl.BlockSpec((W_p, Dout_p), lambda i: (0, 0)),
            pl.BlockSpec((1, Dout_p), lambda i: (0, 0)),
        ],
        out_specs=pl.BlockSpec((tile_b, Dout_p), lambda i: (i, 0)),
        compiler_params=pltpu.CompilerParams(
            dimension_semantics=("parallel",),
            vmem_limit_bytes=vmem_limit,
        ),
        cost_estimate=pl.CostEstimate(
            flops=flops, transcendentals=0, bytes_accessed=bytes_accessed),
    )(x_p, w_in_p, b_in_p, w_blk_p, b_blk_p, w_out_p, b_out_p)

    return out_p[:B, :Dout]


def init_params(key, input_dim, width, depth, output_dim):
    """Deterministic PyTorch-Linear-style uniform init, weights pre-transposed."""
    ks = jax.random.split(key, 6)

    def lin(kw, kb, fan_in, fan_out):
        bound = 1.0 / jnp.sqrt(fan_in)
        w = jax.random.uniform(kw, (fan_in, fan_out), jnp.float32, -bound, bound)
        b = jax.random.uniform(kb, (1, fan_out), jnp.float32, -bound, bound)
        return w, b

    w_in, b_in = lin(ks[0], ks[1], input_dim, width)

    bound = 1.0 / jnp.sqrt(width)
    w_blk = jax.random.uniform(ks[2], (depth, width, width), jnp.float32, -bound, bound)
    b_blk = jax.random.uniform(ks[3], (depth, 1, width), jnp.float32, -bound, bound)

    w_out, b_out = lin(ks[4], ks[5], width, output_dim)

    return {"w_in": w_in, "b_in": b_in,
            "w_blk": w_blk, "b_blk": b_blk,
            "w_out": w_out, "b_out": b_out}


def residual_mlp_ref(x, params, *, depth, compute_dtype=jnp.bfloat16):
    """Pure-JAX reference with the same dtype handling as the kernel
    (bf16 matmul operands, f32 accumulation / bias / residual)."""
    cd = jnp.dtype(compute_dtype)
    h = jnp.dot(x.astype(cd), params["w_in"].astype(cd),
                preferred_element_type=jnp.float32) + params["b_in"]
    for d in range(depth):
        a = jnp.maximum(h, 0.0).astype(cd)
        h = h + jnp.dot(a, params["w_blk"][d].astype(cd),
                        preferred_element_type=jnp.float32) + params["b_blk"][d]
    a = jnp.maximum(h, 0.0).astype(cd)
    return jnp.dot(a, params["w_out"].astype(cd),
                   preferred_element_type=jnp.float32) + params["b_out"]


if __name__ == "__main__":
    batch, input_dim, width, depth, output_dim = 8, 12, 32, 3, 4

    key = jax.random.PRNGKey(0)
    kx, kp = jax.random.split(key)
    x = jax.random.normal(kx, (batch, input_dim), jnp.float32)
    params = init_params(kp, input_dim, width, depth, output_dim)

    out = residual_mlp(x, params, depth=depth)
    out = jax.block_until_ready(out)

    ref = residual_mlp_ref(x, params, depth=depth)
    assert out.shape == (batch, output_dim)
    assert jnp.allclose(out, ref, atol=1e-4, rtol=1e-4), "mismatch vs reference"

    print("KERNEL_OK")
</pallas_src>

<mosaic_0001>
module attributes {stable_mosaic.version = 11 : i64} {
  func.func @_residual_mlp_kernel(%arg0: i32, %arg1: memref<8x128xbf16, #tpu.memory_space<vmem>>, %arg2: memref<128x128xbf16, #tpu.memory_space<vmem>>, %arg3: memref<1x128xf32, #tpu.memory_space<vmem>>, %arg4: memref<3x128x128xbf16, #tpu.memory_space<vmem>>, %arg5: memref<3x1x128xf32, #tpu.memory_space<vmem>>, %arg6: memref<128x128xbf16, #tpu.memory_space<vmem>>, %arg7: memref<1x128xf32, #tpu.memory_space<vmem>>, %arg8: memref<8x128xf32, #tpu.memory_space<vmem>>) attributes {dimension_semantics = [#tpu.dimension_semantics<parallel>], iteration_bounds = array<i64: 1>, scalar_prefetch = 0 : i64, scratch_operands = 0 : i64, tpu.core_type = #tpu.core_type<tc>, window_params = [{transform_indices = @transform_0, window_bounds = array<i64: 8, 128>}, {pipeline_mode = #tpu.pipeline_mode<synchronous>, transform_indices = @transform_1, window_bounds = array<i64: 128, 128>}, {pipeline_mode = #tpu.pipeline_mode<synchronous>, transform_indices = @transform_2, window_bounds = array<i64: 1, 128>}, {pipeline_mode = #tpu.pipeline_mode<synchronous>, transform_indices = @transform_3, window_bounds = array<i64: 3, 128, 128>}, {pipeline_mode = #tpu.pipeline_mode<synchronous>, transform_indices = @transform_4, window_bounds = array<i64: 3, 1, 128>}, {pipeline_mode = #tpu.pipeline_mode<synchronous>, transform_indices = @transform_5, window_bounds = array<i64: 128, 128>}, {pipeline_mode = #tpu.pipeline_mode<synchronous>, transform_indices = @transform_6, window_bounds = array<i64: 1, 128>}, {transform_indices = @transform_7, window_bounds = array<i64: 8, 128>}]} {
    %c0 = arith.constant 0 : index
    %c0_0 = arith.constant 0 : index
    %0 = vector.load %arg1[%c0, %c0_0] : memref<8x128xbf16, #tpu.memory_space<vmem>>, vector<8x128xbf16>
    %c0_1 = arith.constant 0 : index
    %c0_2 = arith.constant 0 : index
    %1 = vector.load %arg2[%c0_1, %c0_2] : memref<128x128xbf16, #tpu.memory_space<vmem>>, vector<128x128xbf16>
    %cst = arith.constant dense<0.000000e+00> : vector<8x128xf32>
    %2 = tpu.matmul %0, %1, %cst {dimension_numbers = #tpu.dot_dimension_numbers<[1], [0], [0], [1], [0, 0, 1, 1], [], []>} : vector<8x128xbf16>, vector<128x128xbf16>, vector<8x128xf32> -> vector<8x128xf32>
    %c0_3 = arith.constant 0 : index
    %c0_4 = arith.constant 0 : index
    %3 = vector.load %arg3[%c0_3, %c0_4] : memref<1x128xf32, #tpu.memory_space<vmem>>, vector<1x128xf32>
    %4 = vector.broadcast %3 : vector<1x128xf32> to vector<8x128xf32>
    %5 = arith.addf %2, %4 : vector<8x128xf32>
    %cst_5 = arith.constant 0.000000e+00 : f32
    %6 = vector.broadcast %cst_5 : f32 to vector<8x128xf32>
    %7 = arith.maximumf %5, %6 : vector<8x128xf32>
    %8 = arith.truncf %7 : vector<8x128xf32> to vector<8x128xbf16>
    %c0_6 = arith.constant 0 : index
    %c0_7 = arith.constant 0 : index
    %c0_8 = arith.constant 0 : index
    %9 = vector.load %arg4[%c0_6, %c0_7, %c0_8] : memref<3x128x128xbf16, #tpu.memory_space<vmem>>, vector<1x128x128xbf16>
    %10 = vector.shape_cast %9 : vector<1x128x128xbf16> to vector<128x128xbf16>
    %cst_9 = arith.constant dense<0.000000e+00> : vector<8x128xf32>
    %11 = tpu.matmul %8, %10, %cst_9 {dimension_numbers = #tpu.dot_dimension_numbers<[1], [0], [0], [1], [0, 0, 1, 1], [], []>} : vector<8x128xbf16>, vector<128x128xbf16>, vector<8x128xf32> -> vector<8x128xf32>
    %12 = arith.addf %5, %11 : vector<8x128xf32>
    %c0_10 = arith.constant 0 : index
    %c0_11 = arith.constant 0 : index
    %c0_12 = arith.constant 0 : index
    %13 = vector.load %arg5[%c0_10, %c0_11, %c0_12] : memref<3x1x128xf32, #tpu.memory_space<vmem>>, vector<1x1x128xf32>
    %14 = vector.shape_cast %13 : vector<1x1x128xf32> to vector<1x128xf32>
    %15 = vector.broadcast %14 : vector<1x128xf32> to vector<8x128xf32>
    %16 = arith.addf %12, %15 : vector<8x128xf32>
    %cst_13 = arith.constant 0.000000e+00 : f32
    %17 = vector.broadcast %cst_13 : f32 to vector<8x128xf32>
    %18 = arith.maximumf %16, %17 : vector<8x128xf32>
    %19 = arith.truncf %18 : vector<8x128xf32> to vector<8x128xbf16>
    %c1 = arith.constant 1 : index
    %c0_14 = arith.constant 0 : index
    %c0_15 = arith.constant 0 : index
    %20 = vector.load %arg4[%c1, %c0_14, %c0_15] : memref<3x128x128xbf16, #tpu.memory_space<vmem>>, vector<1x128x128xbf16>
    %21 = vector.shape_cast %20 : vector<1x128x128xbf16> to vector<128x128xbf16>
    %cst_16 = arith.constant dense<0.000000e+00> : vector<8x128xf32>
    %22 = tpu.matmul %19, %21, %cst_16 {dimension_numbers = #tpu.dot_dimension_numbers<[1], [0], [0], [1], [0, 0, 1, 1], [], []>} : vector<8x128xbf16>, vector<128x128xbf16>, vector<8x128xf32> -> vector<8x128xf32>
    %23 = arith.addf %16, %22 : vector<8x128xf32>
    %c1_17 = arith.constant 1 : index
    %c0_18 = arith.constant 0 : index
    %c0_19 = arith.constant 0 : index
    %24 = vector.load %arg5[%c1_17, %c0_18, %c0_19] : memref<3x1x128xf32, #tpu.memory_space<vmem>>, vector<1x1x128xf32>
    %25 = vector.shape_cast %24 : vector<1x1x128xf32> to vector<1x128xf32>
    %26 = vector.broadcast %25 : vector<1x128xf32> to vector<8x128xf32>
    %27 = arith.addf %23, %26 : vector<8x128xf32>
    %cst_20 = arith.constant 0.000000e+00 : f32
    %28 = vector.broadcast %cst_20 : f32 to vector<8x128xf32>
    %29 = arith.maximumf %27, %28 : vector<8x128xf32>
    %30 = arith.truncf %29 : vector<8x128xf32> to vector<8x128xbf16>
    %c2 = arith.constant 2 : index
    %c0_21 = arith.constant 0 : index
    %c0_22 = arith.constant 0 : index
    %31 = vector.load %arg4[%c2, %c0_21, %c0_22] : memref<3x128x128xbf16, #tpu.memory_space<vmem>>, vector<1x128x128xbf16>
    %32 = vector.shape_cast %31 : vector<1x128x128xbf16> to vector<128x128xbf16>
    %cst_23 = arith.constant dense<0.000000e+00> : vector<8x128xf32>
    %33 = tpu.matmul %30, %32, %cst_23 {dimension_numbers = #tpu.dot_dimension_numbers<[1], [0], [0], [1], [0, 0, 1, 1], [], []>} : vector<8x128xbf16>, vector<128x128xbf16>, vector<8x128xf32> -> vector<8x128xf32>
    %34 = arith.addf %27, %33 : vector<8x128xf32>
    %c2_24 = arith.constant 2 : index
    %c0_25 = arith.constant 0 : index
    %c0_26 = arith.constant 0 : index
    %35 = vector.load %arg5[%c2_24, %c0_25, %c0_26] : memref<3x1x128xf32, #tpu.memory_space<vmem>>, vector<1x1x128xf32>
    %36 = vector.shape_cast %35 : vector<1x1x128xf32> to vector<1x128xf32>
    %37 = vector.broadcast %36 : vector<1x128xf32> to vector<8x128xf32>
    %38 = arith.addf %34, %37 : vector<8x128xf32>
    %cst_27 = arith.constant 0.000000e+00 : f32
    %39 = vector.broadcast %cst_27 : f32 to vector<8x128xf32>
    %40 = arith.maximumf %38, %39 : vector<8x128xf32>
    %41 = arith.truncf %40 : vector<8x128xf32> to vector<8x128xbf16>
    %c0_28 = arith.constant 0 : index
    %c0_29 = arith.constant 0 : index
    %42 = vector.load %arg6[%c0_28, %c0_29] : memref<128x128xbf16, #tpu.memory_space<vmem>>, vector<128x128xbf16>
    %cst_30 = arith.constant dense<0.000000e+00> : vector<8x128xf32>
    %43 = tpu.matmul %41, %42, %cst_30 {dimension_numbers = #tpu.dot_dimension_numbers<[1], [0], [0], [1], [0, 0, 1, 1], [], []>} : vector<8x128xbf16>, vector<128x128xbf16>, vector<8x128xf32> -> vector<8x128xf32>
    %c0_31 = arith.constant 0 : index
    %c0_32 = arith.constant 0 : index
    %44 = vector.load %arg7[%c0_31, %c0_32] : memref<1x128xf32, #tpu.memory_space<vmem>>, vector<1x128xf32>
    %45 = vector.broadcast %44 : vector<1x128xf32> to vector<8x128xf32>
    %46 = arith.addf %43, %45 : vector<8x128xf32>
    %c0_33 = arith.constant 0 : index
    %c0_34 = arith.constant 0 : index
    %47 = vector.load %arg8[%c0_33, %c0_34] : memref<8x128xf32, #tpu.memory_space<vmem>>, vector<8x128xf32>
    tpu.vector_store %arg8[%c0_33, %c0_34], %46 {strides = array<i32>} : memref<8x128xf32, #tpu.memory_space<vmem>>, vector<8x128xf32>,
    return
  }
  func.func @transform_0(%arg0: i32) -> (i32, i32) {
    %c0_i32 = arith.constant 0 : i32
    %c0_i32_0 = arith.constant 0 : i32
    return %arg0, %c0_i32 : i32, i32
  }
  func.func @transform_1(%arg0: i32) -> (i32, i32) {
    %c0_i32 = arith.constant 0 : i32
    %c0_i32_0 = arith.constant 0 : i32
    %c0_i32_1 = arith.constant 0 : i32
    return %c0_i32, %c0_i32_0 : i32, i32
  }
  func.func @transform_2(%arg0: i32) -> (i32, i32) {
    %c0_i32 = arith.constant 0 : i32
    %c0_i32_0 = arith.constant 0 : i32
    %c0_i32_1 = arith.constant 0 : i32
    return %c0_i32, %c0_i32_0 : i32, i32
  }
  func.func @transform_3(%arg0: i32) -> (i32, i32, i32) {
    %c0_i32 = arith.constant 0 : i32
    %c0_i32_0 = arith.constant 0 : i32
    %c0_i32_1 = arith.constant 0 : i32
    %c0_i32_2 = arith.constant 0 : i32
    return %c0_i32, %c0_i32_0, %c0_i32_1 : i32, i32, i32
  }
  func.func @transform_4(%arg0: i32) -> (i32, i32, i32) {
    %c0_i32 = arith.constant 0 : i32
    %c0_i32_0 = arith.constant 0 : i32
    %c0_i32_1 = arith.constant 0 : i32
    %c0_i32_2 = arith.constant 0 : i32
    return %c0_i32, %c0_i32_0, %c0_i32_1 : i32, i32, i32
  }
  func.func @transform_5(%arg0: i32) -> (i32, i32) {
    %c0_i32 = arith.constant 0 : i32
    %c0_i32_0 = arith.constant 0 : i32
    %c0_i32_1 = arith.constant 0 : i32
    return %c0_i32, %c0_i32_0 : i32, i32
  }
  func.func @transform_6(%arg0: i32) -> (i32, i32) {
    %c0_i32 = arith.constant 0 : i32
    %c0_i32_0 = arith.constant 0 : i32
    %c0_i32_1 = arith.constant 0 : i32
    return %c0_i32, %c0_i32_0 : i32, i32
  }
  func.func @transform_7(%arg0: i32) -> (i32, i32) {
    %c0_i32 = arith.constant 0 : i32
    %c0_i32_0 = arith.constant 0 : i32
    return %arg0, %c0_i32 : i32, i32
  }
}

</mosaic_0001>

<bundles_post_ra>
// kernel: tpu_custom_call.1
= control target key start
LH: loop header
LB: loop body
LE: loop exit
PB: predicated region body
PF: predicated region fallthrough
CT: control target
= control target key end

     0   :  { %12 = vsyncpa [#allocation3], 0  ;;  %s1160_s0 = inlined_call_operand.hbm [shape: bf16[8,128], index: 0, kind: input, shape index: {}]   ;;  %s1161_s1 = inlined_call_operand.hbm [shape: bf16[128,128], index: 1, kind: input, shape index: {}]   ;;  %s1162_s2 = inlined_call_operand.vmem [shape: f32[1,128], index: 2, kind: input, shape index: {}]   ;;  %s1163_s3 = inlined_call_operand.hbm [shape: bf16[3,128,128], index: 3, kind: input, shape index: {}]   ;;  %s1164_s4 = inlined_call_operand.vmem [shape: f32[3,1,128], index: 4, kind: input, shape index: {}]   ;;  %s1165_s5 = inlined_call_operand.hbm [shape: bf16[128,128], index: 5, kind: input, shape index: {}]   ;;  %s1166_s6 = inlined_call_operand.vmem [shape: f32[1,128], index: 6, kind: input, shape index: {}]   ;;  %s1167_s7 = inlined_call_operand.hbm [shape: f32[8,128], index: 7, kind: output, shape index: {}]  }
   0x1   :  { %13 = vsyncpa [#allocation6], 0 }
   0x2   :  { %14 = vsyncpa [#allocation9], 0 }
   0x3   :  { %15 = vsyncpa [#allocation4], 0  ;;  %s1022_s24 = smov [#allocation5]  }
   0x4   :  { %s31_s25 = sshll.u32 %s1022_s24, 4  ;;  %s32_s25 = int_to_ptr.vmem [resolvable:$true] %s31_s25 }
   0x5   :  { %s922_s26 = scalar_lea.vmem %s32_s25, 1024  ;;  %p927_p1 = scmp.lt.s32.totalorder %s32_s25, %s32_s25 }
   0x6   :  { %p923_p0 = scmp.ne.s32.totalorder %s32_s25, %s922_s26  ;;  %p928_p2 = scmp.lt.s32.totalorder %s922_s26, %s922_s26 }
   0x8   :  { %p929_p3 = por %p928_p2, %p927_p1 }
   0xa   :  { %p930_p4 = pnand %p929_p3, %p923_p0 }
   0xc   :  { %933 = shalt.err (!%p930_p4)
}
   0xd   :  { %s1023_s27 = smov 64   ;;  %s1024_s28 = smov 4  }
   0xe   :  { %37 = dma.hbm_to_vmem [thread:$0]  %s1161_s1, 1024, %s32_s25, [#allocation6], %s1023_s27, %s1023_s27, %s1024_s28  }
   0xf   :  { %s1025_s8 = smov [#allocation2]   ;;  %s1026_s10 = smov [#allocation7]  }
  0x10   :  { %s22_s9 = sshll.u32 %s1025_s8, 4  ;;  %s45_s11 = sshll.u32 %s1026_s10, 4  ;;  %s23_s9 = int_to_ptr.vmem [resolvable:$true] %s22_s9  ;;  %s46_s11 = int_to_ptr.vmem [resolvable:$true] %s45_s11 }
  0x11   :  { %s942_s12 = scalar_lea.vmem %s23_s9, 64  ;;  %p947_p6 = scmp.lt.s32.totalorder %s23_s9, %s23_s9 }
  0x12   :  { %p943_p5 = scmp.ne.s32.totalorder %s23_s9, %s942_s12  ;;  %p948_p7 = scmp.lt.s32.totalorder %s942_s12, %s942_s12 }
  0x14   :  { %p949_p8 = por %p948_p7, %p947_p6 }
  0x16   :  { %p950_p9 = pnand %p949_p8, %p943_p5 }
  0x18   :  { %953 = shalt.err (!%p950_p9)
}
  0x19   :  { %25 = dma.hbm_to_vmem [thread:$0]  %s1160_s0, 64, %s23_s9, [#allocation3]  }
  0x1a   :  { %s962_s15 = scalar_lea.vmem %s46_s11, 3072  ;;  %p967_p11 = scmp.lt.s32.totalorder %s46_s11, %s46_s11 }
  0x1b   :  { %p963_p10 = scmp.ne.s32.totalorder %s46_s11, %s962_s15  ;;  %p968_p12 = scmp.lt.s32.totalorder %s962_s15, %s962_s15 }
  0x1d   :  { %p969_p13 = por %p968_p12, %p967_p11 }
  0x1f   :  { %p970_p0 = pnand %p969_p13, %p963_p10 }
  0x21   :  { %973 = shalt.err (!%p970_p0)
}
  0x22   :  { %51 = dma.hbm_to_vmem [thread:$0]  %s1163_s3, 3072, %s46_s11, [#allocation6], %s1023_s27, %s1023_s27, %s1024_s28  }
  0x23   :  { %s1027_s17 = smov [#allocation8]  }
  0x24   :  { %s59_s18 = sshll.u32 %s1027_s17, 4  ;;  %s60_s18 = int_to_ptr.vmem [resolvable:$true] %s59_s18 }
  0x25   :  { %s982_s19 = scalar_lea.vmem %s60_s18, 1024  ;;  %p987_p2 = scmp.lt.s32.totalorder %s60_s18, %s60_s18 }
  0x26   :  { %p983_p1 = scmp.ne.s32.totalorder %s60_s18, %s982_s19  ;;  %p988_p3 = scmp.lt.s32.totalorder %s982_s19, %s982_s19 }
  0x28   :  { %p989_p4 = por %p988_p3, %p987_p2 }
  0x2a   :  { %p990_p5 = pnand %p989_p4, %p983_p1 }
  0x2c   :  { %993 = shalt.err (!%p990_p5)
}
  0x2d   :  { %65 = dma.hbm_to_vmem [thread:$0]  %s1165_s5, 1024, %s60_s18, [#allocation9], %s1023_s27, %s1023_s27, %s1024_s28  }
  0x2e   :  { %1014 = dma.done.wait [#allocation3], 64  }
  0x2f   :  { %1015 = vsyncadd [#allocation3], 4294967232 }
  0x30   :  { %1016 = dma.done.wait [#allocation6], 4096  }
  0x31   :  { %1017 = vsyncadd [#allocation6], 4294963200 }
  0x32   :  { %1018 = dma.done.wait [#allocation9], 1024  }
  0x33   :  { %1019 = vsyncadd [#allocation9], 4294966272  ;;  %v1028_v0 = vmov 0.0   ;;  %vm1029_vm0 = vmmov 0   ;;  %v874_v1 = vld [vmem:[#allocation5 + $0x38] sm:$0xff]   ;;  %v875_v2 = vld [vmem:[#allocation5 + $0x30] sm:$0xff]  }
  0x34   :  { %765 = vmatprep.subr.bf16.mxu0 %v1028_v0  ;;  %781 = vmatprep.mubr.msk.bf16.mxu0 %vm1029_vm0, %v1028_v0  ;;  %v876_v3 = vld [vmem:[#allocation5 + $0x28] sm:$0xff]   ;;  %v882_v4 = vld [vmem:[#allocation7 + $0x38] sm:$0xff]   ;;  %v877_v5 = vld [vmem:[#allocation5 + $0x20] sm:$0xff]   ;;  %s1030_s28 = smov [#allocation10]  }
  0x35   :  { %785 = vmatprep.subr.bf16.mxu1 %v1028_v0  ;;  %801 = vmatprep.mubr.msk.bf16.mxu1 %vm1029_vm0, %v1028_v0  ;;  %v883_v6 = vld [vmem:[#allocation7 + $0x30] sm:$0xff]   ;;  %v878_v7 = vld [vmem:[#allocation5 + $0x18] sm:$0xff]   ;;  %v884_v8 = vld [vmem:[#allocation7 + $0x28] sm:$0xff]   ;;  %s662_s29 = sshll.u32 %s1030_s28, 4  ;;  %s663_s29 = int_to_ptr.vmem [resolvable:$true] %s662_s29 }
  0x36   :  { %766 = vmatpush3.bf16.msra.mxu0 %v874_v1  ;;  %786 = vmatpush3.bf16.msra.mxu1 %v882_v4  ;;  %v879_v9 = vld [vmem:[#allocation5 + $0x10] sm:$0xff]   ;;  %v885_v10 = vld [vmem:[#allocation7 + $0x20] sm:$0xff]   ;;  %v880_v11 = vld [vmem:[#allocation5 + $0x8] sm:$0xff]   ;;  %p999_p7 = scmp.lt.s32.totalorder %s663_s29, %s663_s29 }
  0x37   :  { %767 = vmatprep.subr.bf16.mxu0 %v1028_v0  ;;  %787 = vmatprep.subr.bf16.mxu1 %v1028_v0  ;;  %v886_v12 = vld [vmem:[#allocation7 + $0x18] sm:$0xff]   ;;  %v881_v13 = vld [vmem:[#allocation5] sm:$0xff]   ;;  %v887_v14 = vld [vmem:[#allocation7 + $0x10] sm:$0xff]  }
  0x38   :  { %v81_v15 = vld [vmem:[#allocation2] sm:$0xf]  ;;  %v888_v16 = vld [vmem:[#allocation7 + $0x8] sm:$0xff]   ;;  %v889_v17 = vld [vmem:[#allocation7] sm:$0xff]  }
  0x39   :  { %v890_v18 = vld [vmem:[#allocation7 + $0x78] sm:$0xff]   ;;  %v891_v19 = vld [vmem:[#allocation7 + $0x70] sm:$0xff]   ;;  %v892_v20 = vld [vmem:[#allocation7 + $0x68] sm:$0xff]  }
  0x3a   :  { %768 = vmatpush3.bf16.msra.mxu0 %v875_v2  ;;  %788 = vmatpush3.bf16.msra.mxu1 %v883_v6  ;;  %v893_v21 = vld [vmem:[#allocation7 + $0x60] sm:$0xff]   ;;  %v894_v22 = vld [vmem:[#allocation7 + $0x58] sm:$0xff]   ;;  %v895_v23 = vld [vmem:[#allocation7 + $0x50] sm:$0xff]  }
  0x3b   :  { %769 = vmatprep.subr.bf16.mxu0 %v1028_v0  ;;  %789 = vmatprep.subr.bf16.mxu1 %v1028_v0  ;;  %v673_v24 = vld [vmem:[%s1162_s2] ss:$0 sm:$0xff]  ;;  %v896_v32 = vld [vmem:[#allocation7 + $0x48] sm:$0xff]   ;;  %v897_v33 = vld [vmem:[#allocation7 + $0x40] sm:$0xff]  }
  0x3c   :  { %v898_v34 = vld [vmem:[#allocation7 + $0xb8] sm:$0xff]   ;;  %v899_v35 = vld [vmem:[#allocation7 + $0xb0] sm:$0xff]   ;;  %v900_v36 = vld [vmem:[#allocation7 + $0xa8] sm:$0xff]  }
  0x3d   :  { %v901_v37 = vld [vmem:[#allocation7 + $0xa0] sm:$0xff]   ;;  %v902_v38 = vld [vmem:[#allocation7 + $0x98] sm:$0xff]   ;;  %v903_v39 = vld [vmem:[#allocation7 + $0x90] sm:$0xff]  }
  0x3e   :  { %770 = vmatpush3.bf16.msra.mxu0 %v876_v3  ;;  %790 = vmatpush3.bf16.msra.mxu1 %v884_v8  ;;  %v690_v41 = vld [vmem:[%s1164_s4] ss:$0 sm:$0xff]  ;;  %v904_v49 = vld [vmem:[#allocation7 + $0x88] sm:$0xff]   ;;  %v905_v50 = vld [vmem:[#allocation7 + $0x80] sm:$0xff]  }
  0x3f   :  { %771 = vmatprep.subr.bf16.mxu0 %v1028_v0  ;;  %791 = vmatprep.subr.bf16.mxu1 %v1028_v0  ;;  %v906_v51 = vld [vmem:[#allocation8 + $0x38] sm:$0xff]   ;;  %v907_v52 = vld [vmem:[#allocation8 + $0x30] sm:$0xff]   ;;  %v908_v53 = vld [vmem:[#allocation8 + $0x28] sm:$0xff]  }
  0x40   :  { %v909_v54 = vld [vmem:[#allocation8 + $0x20] sm:$0xff]   ;;  %v910_v55 = vld [vmem:[#allocation8 + $0x18] sm:$0xff]   ;;  %v911_v56 = vld [vmem:[#allocation8 + $0x10] sm:$0xff]  }
  0x41   :  { %v700_v58 = vld [vmem:[%s1164_s4 + $0x1] ss:$0 sm:$0xff]  ;;  %v912_v3 = vld [vmem:[#allocation8 + $0x8] sm:$0xff]   ;;  %v913_v4 = vld [vmem:[#allocation8] sm:$0xff]  }
  0x42   :  { %772 = vmatpush3.bf16.msra.mxu0 %v877_v5  ;;  %792 = vmatpush3.bf16.msra.mxu1 %v885_v10  ;;  %v710_v6 = vld [vmem:[%s1164_s4 + $0x2] ss:$0 sm:$0xff]  ;;  %s994_s4 = scalar_lea.vmem %s663_s29, 128 }
  0x43   :  { %773 = vmatprep.subr.bf16.mxu0 %v1028_v0  ;;  %793 = vmatprep.subr.bf16.mxu1 %v1028_v0  ;;  %p995_p6 = scmp.ne.s32.totalorder %s663_s29, %s994_s4  ;;  %p1000_p8 = scmp.lt.s32.totalorder %s994_s4, %s994_s4 }
  0x45   :  { %p1001_p9 = por %p1000_p8, %p999_p7 }
  0x46   :  { %774 = vmatpush3.bf16.msra.mxu0 %v878_v7  ;;  %794 = vmatpush3.bf16.msra.mxu1 %v886_v12 }
  0x47   :  { %775 = vmatprep.subr.bf16.mxu0 %v1028_v0  ;;  %795 = vmatprep.subr.bf16.mxu1 %v1028_v0  ;;  %p1002_p10 = pnand %p1001_p9, %p995_p6 }
  0x4a   :  { %776 = vmatpush3.bf16.msra.mxu0 %v879_v9  ;;  %796 = vmatpush3.bf16.msra.mxu1 %v887_v14  ;;  %v711_v14 = vld [vmem:[%s1166_s6] ss:$0 sm:$0xff] }
  0x4b   :  { %777 = vmatprep.subr.bf16.mxu0 %v1028_v0  ;;  %797 = vmatprep.subr.bf16.mxu1 %v1028_v0 }
  0x4e   :  { %778 = vmatpush3.bf16.msra.mxu0 %v880_v11  ;;  %798 = vmatpush3.bf16.msra.mxu1 %v888_v16 }
  0x4f   :  { %779 = vmatprep.subr.bf16.mxu0 %v1028_v0  ;;  %799 = vmatprep.subr.bf16.mxu1 %v1028_v0 }
  0x52   :  { %780 = vmatpush3.bf16.msra.mxu0 %v881_v13  ;;  %800 = vmatpush3.bf16.msra.mxu1 %v889_v17 }
  0x53   :  { %805 = vmatprep.subr.bf16.mxu0 %v1028_v0  ;;  %825 = vmatprep.subr.bf16.mxu1 %v1028_v0 }
  0x55   :  { %782 = vmatmul.mubr.bf16.vlgmr.msra.gmra.mxu0 %v81_v15 }
  0x56   :  { %821 = vmatprep.mubr.msk.bf16.mxu0 %vm1029_vm0, %v1028_v0  ;;  %806 = vmatpush3.bf16.msra.mxu0 %v890_v18 }
  0x57   :  { %807 = vmatprep.subr.bf16.mxu0 %v1028_v0 }
  0x5a   :  { %808 = vmatpush3.bf16.msra.mxu0 %v891_v19 }
  0x5b   :  { %809 = vmatprep.subr.bf16.mxu0 %v1028_v0 }
  0x5e   :  { %810 = vmatpush3.bf16.msra.mxu0 %v892_v20 }
  0x5f   :  { %811 = vmatprep.subr.bf16.mxu0 %v1028_v0 }
  0x62   :  { %812 = vmatpush3.bf16.msra.mxu0 %v893_v21 }
  0x63   :  { %813 = vmatprep.subr.bf16.mxu0 %v1028_v0 }
  0x66   :  { %814 = vmatpush3.bf16.msra.mxu0 %v894_v22 }
  0x67   :  { %815 = vmatprep.subr.bf16.mxu0 %v1028_v0 }
  0x6a   :  { %816 = vmatpush3.bf16.msra.mxu0 %v895_v23 }
  0x6b   :  { %817 = vmatprep.subr.bf16.mxu0 %v1028_v0 }
  0x6e   :  { %818 = vmatpush3.bf16.msra.mxu0 %v896_v32 }
  0x6f   :  { %819 = vmatprep.subr.bf16.mxu0 %v1028_v0 }
  0x72   :  { %820 = vmatpush3.bf16.msra.mxu0 %v897_v33 }
  0x73   :  { %845 = vmatprep.subr.bf16.mxu0 %v1028_v0 }
 0x115   :  { %v187_v25 = vpop.f32.mrf.mxu0 }
 0x116   :  { %v188_v26 = vadd.f32 %v673_v24, %v187_v25 }
 0x117   :  { %v783_v27 = vpop.f32.mrf.mxu0 }
 0x118   :  { %v193_v28 = vmax.f32 %v188_v26, 0.0 }
 0x119   :  { %v190_v29 = vpop.f32.mrf.mxu0 }
 0x11a   :  { %v194_v30 = vpack.c.bf16 %v193_v28, %v193_v28 }
 0x11b   :  { %v784_v31 = vpop.f32.mrf.mxu0 }
 0x11c   :  { %802 = vmatmul.mubr.bf16.vlgmr.msra.gmra.mxu1 %v194_v30 }
 0x11d   :  { %841 = vmatprep.mubr.msk.bf16.mxu1 %vm1029_vm0, %v1028_v0  ;;  %826 = vmatpush3.bf16.msra.mxu1 %v898_v34 }
 0x11e   :  { %827 = vmatprep.subr.bf16.mxu1 %v1028_v0 }
 0x121   :  { %828 = vmatpush3.bf16.msra.mxu1 %v899_v35 }
 0x122   :  { %829 = vmatprep.subr.bf16.mxu1 %v1028_v0 }
 0x125   :  { %830 = vmatpush3.bf16.msra.mxu1 %v900_v36 }
 0x126   :  { %831 = vmatprep.subr.bf16.mxu1 %v1028_v0 }
 0x129   :  { %832 = vmatpush3.bf16.msra.mxu1 %v901_v37 }
 0x12a   :  { %833 = vmatprep.subr.bf16.mxu1 %v1028_v0 }
 0x12d   :  { %834 = vmatpush3.bf16.msra.mxu1 %v902_v38 }
 0x12e   :  { %835 = vmatprep.subr.bf16.mxu1 %v1028_v0 }
 0x131   :  { %836 = vmatpush3.bf16.msra.mxu1 %v903_v39 }
 0x132   :  { %837 = vmatprep.subr.bf16.mxu1 %v1028_v0 }
 0x135   :  { %838 = vmatpush3.bf16.msra.mxu1 %v904_v49 }
 0x136   :  { %839 = vmatprep.subr.bf16.mxu1 %v1028_v0 }
 0x139   :  { %840 = vmatpush3.bf16.msra.mxu1 %v905_v50 }
 0x1dc   :  { %v293_v40 = vpop.f32.mrf.mxu1 }
 0x1dd   :  { %v299_v42 = vadd.f32 %v293_v40, %v188_v26 }
 0x1de   :  { %v803_v43 = vpop.f32.mrf.mxu1 }
 0x1df   :  { %v307_v44 = vadd.f32 %v690_v41, %v299_v42 }
 0x1e0   :  { %v296_v45 = vpop.f32.mrf.mxu1 }
 0x1e1   :  { %v308_v46 = vmax.f32 %v307_v44, 0.0 }
 0x1e2   :  { %v804_v47 = vpop.f32.mrf.mxu1 }
 0x1e3   :  { %v309_v48 = vpack.c.bf16 %v308_v46, %v308_v46 }
 0x1e5   :  { %822 = vmatmul.mubr.bf16.vlgmr.msra.gmra.mxu0 %v309_v48 }
 0x1e6   :  { %861 = vmatprep.mubr.msk.bf16.mxu0 %vm1029_vm0, %v1028_v0  ;;  %846 = vmatpush3.bf16.msra.mxu0 %v906_v51 }
 0x1e7   :  { %847 = vmatprep.subr.bf16.mxu0 %v1028_v0 }
 0x1ea   :  { %848 = vmatpush3.bf16.msra.mxu0 %v907_v52 }
 0x1eb   :  { %849 = vmatprep.subr.bf16.mxu0 %v1028_v0 }
 0x1ee   :  { %850 = vmatpush3.bf16.msra.mxu0 %v908_v53 }
 0x1ef   :  { %851 = vmatprep.subr.bf16.mxu0 %v1028_v0 }
 0x1f2   :  { %852 = vmatpush3.bf16.msra.mxu0 %v909_v54 }
 0x1f3   :  { %853 = vmatprep.subr.bf16.mxu0 %v1028_v0 }
 0x1f6   :  { %854 = vmatpush3.bf16.msra.mxu0 %v910_v55 }
 0x1f7   :  { %855 = vmatprep.subr.bf16.mxu0 %v1028_v0 }
 0x1fa   :  { %856 = vmatpush3.bf16.msra.mxu0 %v911_v56 }
 0x1fb   :  { %857 = vmatprep.subr.bf16.mxu0 %v1028_v0 }
 0x1fe   :  { %858 = vmatpush3.bf16.msra.mxu0 %v912_v3 }
 0x1ff   :  { %859 = vmatprep.subr.bf16.mxu0 %v1028_v0 }
 0x202   :  { %860 = vmatpush3.bf16.msra.mxu0 %v913_v4 }
 0x2a5   :  { %v409_v57 = vpop.f32.mrf.mxu0 }
 0x2a6   :  { %v415_v59 = vadd.f32 %v409_v57, %v307_v44 }
 0x2a7   :  { %v823_v60 = vpop.f32.mrf.mxu0 }
 0x2a8   :  { %v424_v61 = vadd.f32 %v700_v58, %v415_v59 }
 0x2a9   :  { %v412_v62 = vpop.f32.mrf.mxu0 }
 0x2aa   :  { %v425_v63 = vmax.f32 %v424_v61, 0.0 }
 0x2ab   :  { %v824_v1 = vpop.f32.mrf.mxu0 }
 0x2ac   :  { %v426_v2 = vpack.c.bf16 %v425_v63, %v425_v63 }
 0x2ae   :  { %842 = vmatmul.mubr.bf16.vlgmr.msra.gmra.mxu1 %v426_v2 }
 0x36e   :  { %v526_v5 = vpop.f32.mrf.mxu1 }
 0x36f   :  { %v532_v7 = vadd.f32 %v526_v5, %v424_v61 }
 0x370   :  { %v843_v8 = vpop.f32.mrf.mxu1 }
 0x371   :  { %v541_v9 = vadd.f32 %v710_v6, %v532_v7 }
 0x372   :  { %v529_v10 = vpop.f32.mrf.mxu1 }
 0x373   :  { %v542_v11 = vmax.f32 %v541_v9, 0.0 }
 0x374   :  { %v844_v12 = vpop.f32.mrf.mxu1 }
 0x375   :  { %v543_v13 = vpack.c.bf16 %v542_v11, %v542_v11 }
 0x377   :  { %862 = vmatmul.mubr.bf16.vlgmr.msra.gmra.mxu0 %v543_v13 }
 0x437   :  { %v649_v0 = vpop.f32.mrf.mxu0 }
 0x438   :  { %v650_v15 = vadd.f32 %v711_v14, %v649_v0 }
 0x439   :  { %v863_v16 = vpop.f32.mrf.mxu0 }
 0x43a   :  { %655 = vst [vmem:[#allocation10] sm:$0xff] %v650_v15 }
 0x43b   :  { %v652_v17 = vpop.f32.mrf.mxu0 }
 0x43c   :  { %1005 = shalt.err (!%p1002_p10)
}
 0x43d   :  { %665 = dma.vmem_to_hbm [thread:$0]  %s663_s29, 128, %s1167_s7, [#allocation4]   ;;  %v864_v18 = vpop.f32.mrf.mxu0 }
 0x43e   :  { %1020 = dma.done.wait [#allocation4], 128  }
 0x43f   :  { %1021 = vsyncadd [#allocation4], 4294967168 }
 0x440   :  { %669 = vsyncpa [#allocation3], 1 }
 0x441   :  { %670 = vsyncpa [#allocation6], 1 }
 0x442   :  { %671 = vsyncpa [#allocation9], 1 }
 0x443   :  { %672 = vsyncpa [#allocation4], 1 }

</bundles_post_ra>
